<compile_context>
chip_gen: v6e
topology: v6e:2x2x1
jax: 0.10.0
libtpu: 0.0.40
codegen_flags: <defaults>
</compile_context>

<pallas_src>
from functools import partial

import jax
import jax.numpy as jnp
import numpy as np
from jax import lax
from jax.experimental import pallas as pl
from jax.experimental.pallas import tpu as pltpu

_MIB = 1024 * 1024


def _grad_kernel(a_ref, out_ref):
    t = pl.program_id(1)

    @pl.when(t == 0)
    def _init():
        out_ref[...] = jnp.zeros_like(out_ref)

    x = a_ref[...].astype(jnp.float32)            # (G, TH, W)
    _, th, w = x.shape
    # Trace-time choice: roll (XLU) fast path only for (8,128)-aligned blocks,
    # proven slice path otherwise.
    aligned = (th % 8 == 0) and (w % 128 == 0)

    # Horizontal (lane-direction) neighbour differences.
    if w < 2:
        sdx = jnp.float32(0.0)
    elif aligned:
        dx = jnp.abs(x - pltpu.roll(x, 1, axis=2))
        wrap_x = jnp.abs(x[:, :, w - 1:] - x[:, :, :1])      # (G, TH, 1) wrap pair
        sdx = jnp.sum(dx) - jnp.sum(wrap_x)
    else:
        sdx = jnp.sum(jnp.abs(x[:, :, :-1] - x[:, :, 1:]))

    # Vertical (sublane-direction) neighbour differences.
    if th < 2:
        sdy = jnp.float32(0.0)
    elif aligned:
        dy = jnp.abs(x - pltpu.roll(x, 1, axis=1))
        wrap_y = jnp.abs(x[:, th - 1:, :] - x[:, :1, :])     # (G, 1, W) wrap pair
        sdy = jnp.sum(dy) - jnp.sum(wrap_y)
    else:
        sdy = jnp.sum(jnp.abs(x[:, :-1, :] - x[:, 1:, :]))

    # Fused lane-dense partial-sum accumulator: lanes 0-127 = dx, 128-255 = dy.
    lane = lax.broadcasted_iota(jnp.int32, out_ref.shape, 2)
    out_ref[...] += jnp.where(lane < 128, sdx, sdy)


def _vmem_capacity_bytes():
    try:
        return int(pltpu.get_tpu_info().vmem_capacity_bytes)
    except Exception:
        return 64 * _MIB          # conservative fallback (v7x-sized VMEM)


def _choose_blocking(N, H, W, itemsize, budget):
    """Returns (G, S, TH, T, H_pad, N_pad) for blocks of shape (G, TH, W)."""
    per_img = H * W * itemsize
    if per_img <= budget:
        TH, T, H_pad = H, 1, H
        g = max(1, min(N, budget // per_img))
        if N >= 2:
            g = min(g, -(-N // 2))          # >= 2 grid steps (v7x megacore)
        # Prefer a divisor of N close to g (no padding); otherwise pad N.
        G = g
        for d in range(g, max(1, (g + 1) // 2) - 1, -1):
            if N % d == 0:
                G = d
                break
        S = -(-N // G)
    else:
        # Single image larger than the budget: tile H in multiples of 8.
        # TODO(synk): images whose single padded row exceeds the budget
        # (W * itemsize > budget) would additionally need W-tiling.
        G, S = 1, N
        TH = max(8, (budget // (W * itemsize)) // 8 * 8)
        TH = min(TH, -(-H // 8) * 8)
        T = -(-H // TH)
        H_pad = T * TH
    return G, S, TH, T, H_pad, S * G


@partial(jax.jit, static_argnames=("block_budget_bytes",))
def gradient_loss(a, block_budget_bytes=None):
    """Pallas implementation of GradientLoss().forward(a) -> scalar (float32)."""
    B, C, H, W = a.shape
    N = B * C
    itemsize = jnp.dtype(a.dtype).itemsize
    a_img = a.reshape(N, H, W)                 # native dtype; cast inside kernel

    vmem_cap = _vmem_capacity_bytes()
    if block_budget_bytes is None:
        budget = max(_MIB, min(12 * _MIB, (vmem_cap - 16 * _MIB) // 8))
    else:
        budget = int(block_budget_bytes)

    G, S, TH, T, H_pad, N_pad = _choose_blocking(N, H, W, itemsize, budget)

    # Exact corrections for vertical pairs hidden / introduced by H-tiling.
    extra_dy = jnp.float32(0.0)
    if T > 1:
        rows = np.arange(1, T) * TH                       # all < H by construction
        lo = a_img[:, rows - 1, :].astype(jnp.float32)
        hi = a_img[:, rows, :].astype(jnp.float32)
        extra_dy = extra_dy + jnp.sum(jnp.abs(lo - hi))   # pairs straddling H-blocks
    if H % TH != 0:                                       # spurious (H-1, zero-pad) pair
        extra_dy = extra_dy - jnp.sum(jnp.abs(a_img[:, H - 1, :].astype(jnp.float32)))

    a_pad = a_img
    if N_pad > N or H_pad > H:
        # Zero images / zero rows contribute exactly 0 to both gradient sums.
        a_pad = jnp.pad(a_img, ((0, N_pad - N), (0, H_pad - H), (0, 0)))

    # Right-sized VMEM limit: 2x double-buffered input block + in-kernel f32
    # temporaries + headroom, capped below physical VMEM.
    block_native = G * TH * W * itemsize
    block_f32 = G * TH * W * 4
    vmem_limit = int(min(2 * block_native + 4 * block_f32 + 8 * _MIB,
                         max(vmem_cap - 8 * _MIB, 32 * _MIB)))

    out = pl.pallas_call(
        _grad_kernel,
        out_shape=jax.ShapeDtypeStruct((S, 1, 256), jnp.float32),
        grid_spec=pltpu.PrefetchScalarGridSpec(
            num_scalar_prefetch=0,
            grid=(S, T),
            in_specs=[pl.BlockSpec((G, TH, W), lambda s, t: (s, t, 0))],
            out_specs=pl.BlockSpec((1, 1, 256), lambda s, t: (s, 0, 0))),
        compiler_params=pltpu.CompilerParams(
            dimension_semantics=("parallel", "arbitrary"),
            vmem_limit_bytes=vmem_limit),
    )(a_pad)

    sum_dx = jnp.sum(out[:, 0, 0])
    sum_dy = jnp.sum(out[:, 0, 128]) + extra_dy
    mean_dx = sum_dx / (N * H * (W - 1))       # torch.mean(gradient_a_x)
    mean_dy = sum_dy / (N * (H - 1) * W)       # torch.mean(gradient_a_y)
    return mean_dx + mean_dy


# ----------------------- pure-JAX reference (for checks) --------------------
def _loss_ref(a):
    gx = jnp.abs(a[:, :, :, :-1] - a[:, :, :, 1:])
    gy = jnp.abs(a[:, :, :-1, :] - a[:, :, 1:, :])
    return jnp.mean(gx) + jnp.mean(gy)


def _check(a, **kw):
    out = jax.block_until_ready(gradient_loss(a, **kw))
    ref = jax.block_until_ready(_loss_ref(a.astype(jnp.float32)))
    np.testing.assert_allclose(np.asarray(out), np.asarray(ref),
                               rtol=5e-5, atol=1e-6)


if __name__ == "__main__":
    key = jax.random.PRNGKey(0)
    k0, k1, k2, k3 = jax.random.split(key, 4)

    # Primary shape implied by the module spec: NCHW = (2, 4, 16, 16).
    _check(jax.random.uniform(k0, (2, 4, 16, 16), dtype=jnp.float32))

    # (8,128)-aligned blocks -> pltpu.roll fast path.
    _check(jax.random.uniform(k1, (1, 2, 32, 256), dtype=jnp.float32))

    # B*C with no convenient divisor -> zero-padded image count.
    _check(jax.random.uniform(k2, (1, 5, 16, 16), dtype=jnp.float32))

    # Forced tiny block budget -> H-tiling path with exact boundary corrections.
    _check(jax.random.uniform(k3, (1, 3, 100, 96), dtype=jnp.float32),
           block_budget_bytes=16 * 1024)

    print("KERNEL_OK")
</pallas_src>

<mosaic_0001>
module attributes {stable_mosaic.version = 11 : i64} {
  func.func @_grad_kernel(%arg0: i32, %arg1: i32, %arg2: memref<4x16x16xf32, #tpu.memory_space<vmem>>, %arg3: memref<1x1x256xf32, #tpu.memory_space<vmem>>) attributes {dimension_semantics = [#tpu.dimension_semantics<parallel>, #tpu.dimension_semantics<arbitrary>], iteration_bounds = array<i64: 2, 1>, scalar_prefetch = 0 : i64, scratch_operands = 0 : i64, tpu.core_type = #tpu.core_type<tc>, window_params = [{transform_indices = @transform_0, window_bounds = array<i64: 4, 16, 16>}, {transform_indices = @transform_1, window_bounds = array<i64: 1, 1, 256>}]} {
    %c0_i32 = arith.constant 0 : i32
    %0 = arith.cmpi eq, %arg1, %c0_i32 : i32
    %1 = arith.extui %0 : i1 to i32
    %c0_i32_0 = arith.constant 0 : i32
    %2 = arith.cmpi ne, %1, %c0_i32_0 : i32
    scf.if %2 {
      %cst_10 = arith.constant 0.000000e+00 : f32
      %29 = vector.broadcast %cst_10 : f32 to vector<1x1x256xf32>
      %c0_11 = arith.constant 0 : index
      %c0_12 = arith.constant 0 : index
      %c0_13 = arith.constant 0 : index
      %30 = vector.load %arg3[%c0_11, %c0_12, %c0_13] : memref<1x1x256xf32, #tpu.memory_space<vmem>>, vector<1x1x256xf32>
      tpu.vector_store %arg3[%c0_11, %c0_12, %c0_13], %29 {strides = array<i32>} : memref<1x1x256xf32, #tpu.memory_space<vmem>>, vector<1x1x256xf32>,
    } else {
    }
    %c0 = arith.constant 0 : index
    %c0_1 = arith.constant 0 : index
    %c0_2 = arith.constant 0 : index
    %3 = vector.load %arg2[%c0, %c0_1, %c0_2] : memref<4x16x16xf32, #tpu.memory_space<vmem>>, vector<4x16x16xf32>
    %4 = vector.extract_strided_slice %3 {offsets = [0, 0, 0], sizes = [4, 16, 15], strides = [1, 1, 1]} : vector<4x16x16xf32> to vector<4x16x15xf32>
    %5 = vector.extract_strided_slice %3 {offsets = [0, 0, 1], sizes = [4, 16, 15], strides = [1, 1, 1]} : vector<4x16x16xf32> to vector<4x16x15xf32>
    %6 = arith.subf %4, %5 : vector<4x16x15xf32>
    %7 = math.absf %6 : vector<4x16x15xf32>
    %8 = vector.shape_cast %7 : vector<4x16x15xf32> to vector<1x4x16x15xf32>
    %cst = arith.constant dense<0.000000e+00> : vector<1xf32>
    %9 = vector.multi_reduction <add>, %8, %cst [1, 2, 3] : vector<1x4x16x15xf32> to vector<1xf32>
    %10 = vector.shape_cast %9 : vector<1xf32> to vector<1x1x1x1xf32>
    %11 = vector.extract %10[0, 0, 0, 0] : f32 from vector<1x1x1x1xf32>
    %12 = vector.extract_strided_slice %3 {offsets = [0, 0, 0], sizes = [4, 15, 16], strides = [1, 1, 1]} : vector<4x16x16xf32> to vector<4x15x16xf32>
    %13 = vector.extract_strided_slice %3 {offsets = [0, 1, 0], sizes = [4, 15, 16], strides = [1, 1, 1]} : vector<4x16x16xf32> to vector<4x15x16xf32>
    %14 = arith.subf %12, %13 : vector<4x15x16xf32>
    %15 = math.absf %14 : vector<4x15x16xf32>
    %16 = vector.shape_cast %15 : vector<4x15x16xf32> to vector<1x4x15x16xf32>
    %cst_3 = arith.constant dense<0.000000e+00> : vector<1xf32>
    %17 = vector.multi_reduction <add>, %16, %cst_3 [1, 2, 3] : vector<1x4x15x16xf32> to vector<1xf32>
    %18 = vector.shape_cast %17 : vector<1xf32> to vector<1x1x1x1xf32>
    %19 = vector.extract %18[0, 0, 0, 0] : f32 from vector<1x1x1x1xf32>
    %20 = tpu.iota {dimensions = array<i32: 2>} : vector<1x1x256xi32>
    %c0_4 = arith.constant 0 : index
    %c0_5 = arith.constant 0 : index
    %c0_6 = arith.constant 0 : index
    %21 = vector.load %arg3[%c0_4, %c0_5, %c0_6] : memref<1x1x256xf32, #tpu.memory_space<vmem>>, vector<1x1x256xf32>
    %c128_i32 = arith.constant 128 : i32
    %22 = vector.broadcast %c128_i32 : i32 to vector<1x1x256xi32>
    %23 = arith.cmpi slt, %20, %22 : vector<1x1x256xi32>
    %24 = vector.broadcast %11 : f32 to vector<1x1x256xf32>
    %25 = vector.broadcast %19 : f32 to vector<1x1x256xf32>
    %26 = arith.select %23, %24, %25 : vector<1x1x256xi1>, vector<1x1x256xf32>
    %27 = arith.addf %21, %26 : vector<1x1x256xf32>
    %c0_7 = arith.constant 0 : index
    %c0_8 = arith.constant 0 : index
    %c0_9 = arith.constant 0 : index
    %28 = vector.load %arg3[%c0_7, %c0_8, %c0_9] : memref<1x1x256xf32, #tpu.memory_space<vmem>>, vector<1x1x256xf32>
    tpu.vector_store %arg3[%c0_7, %c0_8, %c0_9], %27 {strides = array<i32>} : memref<1x1x256xf32, #tpu.memory_space<vmem>>, vector<1x1x256xf32>,
    return
  }
  func.func @transform_0(%arg0: i32, %arg1: i32) -> (i32, i32, i32) {
    %c0_i32 = arith.constant 0 : i32
    %c0_i32_0 = arith.constant 0 : i32
    return %arg0, %arg1, %c0_i32 : i32, i32, i32
  }
  func.func @transform_1(%arg0: i32, %arg1: i32) -> (i32, i32, i32) {
    %c0_i32 = arith.constant 0 : i32
    %c0_i32_0 = arith.constant 0 : i32
    %c0_i32_1 = arith.constant 0 : i32
    return %arg0, %c0_i32, %c0_i32_0 : i32, i32, i32
  }
}

</mosaic_0001>

<bundles_post_ra>
// kernel: gradient_loss.1
= control target key start
LH: loop header
LB: loop body
LE: loop exit
PB: predicated region body
PF: predicated region fallthrough
CT: control target
= control target key end

     0   :  { %6 = vsyncpa [#allocation3], 0  ;;  %s769_s0 = inlined_call_operand.hbm [shape: f32[8,16,16], index: 0, kind: input, shape index: {}]   ;;  %s770_s1 = inlined_call_operand.vmem [shape: f32[2,1,256], index: 1, kind: output, shape index: {}]  }
   0x1   :  { %8 = vsyncpa [#allocation3 + $0x1], 0  ;;  %s592_s6 = smov 0   ;;  %s594_s7 = smov 0  }
   0x2   :  { %s596_s8 = smov 0   ;;  %s598_s9 = smov 0  }
   0x3   :  { %s600_s10 = smov 0   ;;  %s602_s11 = smov 0  }
   0x4 LB: > { %s417_s12 = sadd.s32 4294967295, %s574_s11   ;;  %s26_s13 = sadd.s32 1, %s570_s10  ;;  %s574_s11 = sphi %s602_s11, %s14_s11   ;;  %s570_s10 = sphi %s600_s10, %s780_s10   ;;  %s566_s9 = sphi %s598_s9, %s779_s9   ;;  %s562_s8 = sphi %s596_s8, %s778_s8   ;;  %s558_s7 = sphi %s594_s7, %s777_s7   ;;  %s554_s6 = sphi %s592_s6, %s776_s6  }
   0x5   : > { %p28_p0 = scmp.ge.s32.totalorder %s26_s13, 2  ;;  %s35_s14 = sadd.s32 1, %s562_s8 }
   0x6   : > { %p42_p1 = scmp.ne.s32.totalorder %s562_s8, %s558_s7  ;;  %p43_p2 = scmp.eq.s32.totalorder %s574_s11, 0 }
   0x7   : > { %s782_s13 = smov (%p28_p0, %s26_s13), 0  ;;  %p48_p4 = scmp.ne.s32.totalorder %s558_s7, %s554_s6 }
   0x8   : > { %p628_p3 = por %p43_p2, %p42_p1  ;;  %s30_s16 = ssub.s32 %s570_s10, %s782_s13 }
   0x9   : > { %p49_p5 = scmp.eq.s32.totalorder %s417_s12, 0  ;;  %p33_p6 = scmp.eq.s32.totalorder %s30_s16, 0 }
   0xa   : > { %p442_p8 = scmp.lt.s32.totalorder %s574_s11, 2  ;;  %s98_s19 = sand.u32 1, %s562_s8  }
   0xb   : > { %p635_p7 = por %p49_p5, %p48_p4  ;;  %s431_s20 = sshll.u32 %s570_s10, 10 }
   0xc   : > { %s641_s18 = scalar_select %p33_p6, %s562_s8, %s35_s14  }
   0xd   : > { %s421_s21 = sshll.u32 %s98_s19, 6  ;;  %s111_s24 = scalar_lea.hbm %s769_s0, %s431_s20 }
   0xe   : > { %s102_s25 = scalar_lea.vmem [#allocation2], %s421_s21  ;;  %p650_p9 = pnand %p442_p8, %p628_p3 }
   0xf   : > { %s112_s26 = sshll.u32 %s102_s25, 4  ;;  %s99_s28 = scalar_lea.sflag [#allocation3], %s98_s19  ;;  %s113_s26 = int_to_ptr.vmem [resolvable:$true] %s112_s26 }
  0x10   : > { %p498_p10 = pneg %p650_p9  ;;  %s509_s29 = scalar_lea.vmem %s113_s26, 1024 }
  0x11   : > { %p510_p11 = scmp.ne.s32.totalorder %s113_s26, %s509_s29  ;;  %s576_s30 = smov [#allocation2]  }
  0x12   : > { %s514_s2 = sshll.u32 %s576_s30, 4  ;;  %s515_s2 = int_to_ptr.vmem [resolvable:$false] %s514_s2 }
  0x13   : > { %p512_p12 = pnand %p510_p11, %p498_p10  ;;  %s516_s3 = scalar_lea.vmem %s515_s2, 2048 }
  0x14   : > { %p517_p0 = scmp.lt.s32.totalorder %s113_s26, %s515_s2  ;;  %p518_p1 = scmp.lt.s32.totalorder %s516_s3, %s509_s29 }
  0x15   : > { %p513_p13 = pneg %p512_p12 }
  0x16   : > { %p519_p2 = por %p518_p1, %p517_p0 }
  0x18   : > { %p520_p3 = pnand %p519_p2, %p513_p13 }
  0x1a   : > { %523 = shalt.err (!%p520_p3)
}
  0x1b   : > { %s577_s4 = smov 128   ;;  %s578_s5 = smov 8  }
  0x1c   : > { %441 = dma.hbm_to_vmem [thread:$0]  (!%p650_p9), %s111_s24, 1024, %s113_s26, %s99_s28, %s577_s4, %s577_s4, %s578_s5  }
  0x1d   : > { %p425_p4 = scmp.ge.s32.totalorder %s574_s11, 1  ;;  %p120_p5 = scmp.lt.s32.totalorder %s574_s11, 3 }
  0x1f   : > { %p121_p6 = pnand %p425_p4, %p120_p5 }
  0x20   : > { %s126_s6 = sand.u32 (!%p121_p6), 1, %s558_s7  }
  0x21   : > { %124 = sbr.rel (%p121_p6) target bundleno = 389 (0x185), region = 24  ;;  %s426_s12 = sshll.u32 (!%p121_p6), %s126_s6, 6 }
  0x22   : > { %s127_s14 = scalar_lea.sflag (!%p121_p6), [#allocation3], %s126_s6  ;;  %s130_s15 = scalar_lea.vmem (!%p121_p6), [#allocation2], %s426_s12 }
  0x26   : > { %549 = dma.done.wait (%p635_p7), %s127_s14, 1024  }
  0x27   : > { %551 = vsyncadd (%p635_p7), %s127_s14, 4294966272  ;;  %v665_v0 = vld [vmem:[%s130_s15] sm:$0xff]  ;;  %v667_v1 = vld [vmem:[%s130_s15 + $0x10] sm:$0xff]  ;;  %s579_s16 = smov 127   ;;  %vm244_vm0 = vcmask 1046528   ;;  %vm281_vm1 = vcmask 130048  }
  0x28   : > { %179 = vrot.lane.b32.xlu0 %v665_v0, %s579_s16  ;;  %183 = vrot.lane.b32.xlu1 %v667_v1, %s579_s16  ;;  %v671_v2 = vld [vmem:[%s130_s15 + $0x8] sm:$0xff]  ;;  %v673_v3 = vld [vmem:[%s130_s15 + $0x18] sm:$0xff]  ;;  %v245_v4 = vrot.slane %v665_v0, 1  ;;  %v248_v8 = vrot.slane %v667_v1, 1  ;;  %vm283_vm2 = vcmask 129024   ;;  %vm219_vm3 = vcmask 121856  }
  0x29   : > { %v246_v5 = vrot.slane %v671_v2, 1  ;;  %v679_v6 = vld [vmem:[%s130_s15 + $0x20] sm:$0xff]  ;;  %v681_v7 = vld [vmem:[%s130_s15 + $0x28] sm:$0xff]  ;;  %v249_v10 = vrot.slane %v673_v3, 1  ;;  %v690_v13 = vld [vmem:[%s130_s15 + $0x30] sm:$0xff]  ;;  %p150_p7 = scmp.lt.s32.totalorder %s566_s9, 1 }
  0x2a   : > { %v692_v14 = vld [vmem:[%s130_s15 + $0x38] sm:$0xff]  ;;  %v251_v19 = vrot.slane %v679_v6, 1  ;;  %v252_v20 = vrot.slane %v681_v7, 1  ;;  %v254_v30 = vrot.slane %v690_v13, 1 }
  0x2b   : > { %v247_v9 = vsel %vm244_vm0, %v245_v4, %v246_v5  ;;  %v266_v11 = vsub.f32 %v671_v2, %v246_v5  ;;  %v250_v15 = vsel %vm244_vm0, %v248_v8, %v249_v10  ;;  %v268_v21 = vsub.f32 %v673_v3, %v249_v10  ;;  %s784_s9 = smov (!%p150_p7, %s566_s9), 1 }
  0x2c   : > { %181 = vrot.lane.b32.xlu0 %v671_v2, %s579_s16  ;;  %185 = vrot.lane.b32.xlu1 %v673_v3, %s579_s16  ;;  %v265_v12 = vsub.f32 %v665_v0, %v247_v9  ;;  %v267_v18 = vsub.f32 %v667_v1, %v250_v15  ;;  %v253_v25 = vsel %vm244_vm0, %v251_v19, %v252_v20  ;;  %v255_v31 = vrot.slane %v692_v14, 1  ;;  %s427_s17 = sshll.u32 %s784_s9, 1 }
  0x2d   : > { %v274_v16 = vand.u32 2147483647, %v266_v11  ;;  %v276_v27 = vand.u32 2147483647, %v268_v21  ;;  %v269_v28 = vsub.f32 %v679_v6, %v253_v25  ;;  %v270_v33 = vsub.f32 %v681_v7, %v252_v20  ;;  %s738_s21 = scalar_lea.vmem %s770_s1, %s427_s17 }
  0x2e   : > { %v273_v17 = vand.u32 2147483647, %v265_v12  ;;  %v275_v22 = vand.u32 2147483647, %v267_v18  ;;  %v256_v36 = vsel %vm244_vm0, %v254_v30, %v255_v31  ;;  %v272_v42 = vsub.f32 %v692_v14, %v255_v31 }
  0x2f   : > { %v284_v24 = vsel %vm283_vm2, %v274_v16, 0.0  ;;  %v277_v34 = vand.u32 2147483647, %v269_v28  ;;  %v288_v35 = vsel %vm283_vm2, %v276_v27, 0.0  ;;  %v278_v38 = vand.u32 2147483647, %v270_v33 }
  0x30   : > { %187 = vrot.lane.b32.xlu0 %v679_v6, %s579_s16  ;;  %189 = vrot.lane.b32.xlu1 %v681_v7, %s579_s16  ;;  %v282_v23 = vsel %vm281_vm1, %v273_v17, 0.0  ;;  %v286_v29 = vsel %vm281_vm1, %v275_v22, 0.0  ;;  %v271_v39 = vsub.f32 %v690_v13, %v256_v36  ;;  %v280_v46 = vand.u32 2147483647, %v272_v42 }
  0x31   : > { %v285_v26 = vadd.f32 %v284_v24, %v282_v23  ;;  %v290_v40 = vsel %vm281_vm1, %v277_v34, 0.0  ;;  %v292_v44 = vsel %vm283_vm2, %v278_v38, 0.0  ;;  %v158_v28 = vlaneseq }
  0x32   : > { %v279_v43 = vand.u32 2147483647, %v271_v39  ;;  %v296_v49 = vsel %vm283_vm2, %v280_v46, 0.0 }
  0x33   : > { %v287_v32 = vadd.f32 %v286_v29, %v285_v26  ;;  %vm740_vm4 = vcmp.lt.s32.totalorder %v158_v28, 256  ;;  %v324_v46 = vshrl.u32 %v158_v28, 7 }
  0x34   : > { %191 = vrot.lane.b32.xlu0 %v690_v13, %s579_s16  ;;  %193 = vrot.lane.b32.xlu1 %v692_v14, %s579_s16  ;;  %v294_v47 = vsel %vm281_vm1, %v279_v43, 0.0  ;;  %v581_v43 = vmov 1966171168  }
  0x35   : > { %v289_v37 = vadd.f32 %v288_v35, %v287_v32 }
  0x37   : > { %v291_v41 = vadd.f32 %v290_v40, %v289_v37 }
  0x39   : > { %v293_v45 = vadd.f32 %v292_v44, %v291_v41  ;;  %v321_v44 = vunpack.c.l.s4 %v581_v43 }
  0x3b   : > { %v295_v48 = vadd.f32 %v294_v47, %v293_v45  ;;  %v322_v45 = vunpack.c.0.s8 %v321_v44 }
  0x3d   : > { %v297_v50 = vadd.f32 %v296_v49, %v295_v48  ;;  %v325_v48 = vsub.s32 %v322_v45, %v324_v46 }
  0x58   : > { %298 = vadd.xlane.f32.xlu1 %v297_v50 }
  0x9a   : > { %v180_v51 = vpop.permute.xlu0 %179  ;;  %v184_v52 = vpop.permute.xlu1 %183 }
  0x9b   : > { %v203_v53 = vsub.f32 %v665_v0, %v180_v51  ;;  %v205_v54 = vsub.f32 %v667_v1, %v184_v52 }
  0x9d   : > { %v211_v57 = vand.u32 2147483647, %v203_v53  ;;  %v213_v60 = vand.u32 2147483647, %v205_v54 }
  0x9e   : > { %v182_v55 = vpop.permute.xlu0 %181  ;;  %v186_v56 = vpop.permute.xlu1 %185 }
  0x9f   : > { %v204_v58 = vsub.f32 %v671_v2, %v182_v55  ;;  %v206_v59 = vsub.f32 %v673_v3, %v186_v56  ;;  %v220_v5 = vsel %vm219_vm3, %v211_v57, 0.0  ;;  %v223_v10 = vsel %vm219_vm3, %v213_v60, 0.0 }
  0xa1   : > { %v212_v61 = vand.u32 2147483647, %v204_v58  ;;  %v214_v62 = vand.u32 2147483647, %v206_v59 }
  0xa2   : > { %v188_v63 = vpop.permute.xlu0 %187  ;;  %v190_v4 = vpop.permute.xlu1 %189 }
  0xa3   : > { %v221_v8 = vsel %vm219_vm3, %v212_v61, 0.0  ;;  %v207_v0 = vsub.f32 %v679_v6, %v188_v63  ;;  %v208_v1 = vsub.f32 %v681_v7, %v190_v4  ;;  %v225_v2 = vsel %vm219_vm3, %v214_v62, 0.0 }
  0xa4   : > { %v222_v9 = vadd.f32 %v221_v8, %v220_v5 }
  0xa5   : > { %v215_v3 = vand.u32 2147483647, %v207_v0  ;;  %v216_v11 = vand.u32 2147483647, %v208_v1 }
  0xa6   : > { %v224_v12 = vadd.f32 %v223_v10, %v222_v9  ;;  %v192_v15 = vpop.permute.xlu0 %191  ;;  %v194_v16 = vpop.permute.xlu1 %193 }
  0xa7   : > { %v227_v17 = vsel %vm219_vm3, %v215_v3, 0.0  ;;  %v209_v18 = vsub.f32 %v690_v13, %v192_v15  ;;  %v210_v6 = vsub.f32 %v692_v14, %v194_v16  ;;  %v229_v7 = vsel %vm219_vm3, %v216_v11, 0.0 }
  0xa8   : > { %v226_v19 = vadd.f32 %v225_v2, %v224_v12  ;;  %v580_v14 = vmov 0.0  }
  0xa9   : > { %v217_v20 = vand.u32 2147483647, %v209_v18  ;;  %v218_v21 = vand.u32 2147483647, %v210_v6  ;;  %162 = vst.msk [vmem:[%s738_s21] sm:$0x3] %vm740_vm4, %v580_v14 }
  0xaa   : > { %v228_v22 = vadd.f32 %v227_v17, %v226_v19 }
  0xab   : > { %v231_v23 = vsel %vm219_vm3, %v217_v20, 0.0  ;;  %v233_v25 = vsel %vm219_vm3, %v218_v21, 0.0 }
  0xac   : > { %v230_v24 = vadd.f32 %v229_v7, %v228_v22 }
  0xae   : > { %v232_v26 = vadd.f32 %v231_v23, %v230_v24 }
  0xb0   : > { %v234_v27 = vadd.f32 %v233_v25, %v232_v26  ;;  %v310_v52 = vld [vmem:[%s738_s21] sm:$0x3] }
  0xb2   : > { %235 = vadd.xlane.f32.xlu0 %v234_v27 }
  0xe1   : > { %v299_v29 = vpop.xlane.xlu1 %298 }
  0xe2   : > { %v300_v30 = vrot.slane %v299_v29, 4 }
  0xe4   : > { %v301_v31 = vadd.f32 %v300_v30, %v299_v29 }
  0xe6   : > { %v302_v32 = vrot.slane %v301_v31, 2 }
  0xe8   : > { %v303_v36 = vadd.f32 %v302_v32, %v301_v31 }
  0xea   : > { %v304_v39 = vrot.slane %v303_v36, 1 }
  0xec   : > { %v305_v42 = vadd.f32 %v304_v39, %v303_v36 }
 0x13b   : > { %v236_v33 = vpop.xlane.xlu0 %235 }
 0x13c   : > { %v237_v34 = vrot.slane %v236_v33, 4 }
 0x13e   : > { %v238_v35 = vadd.f32 %v237_v34, %v236_v33 }
 0x140   : > { %v239_v37 = vrot.slane %v238_v35, 2 }
 0x142   : > { %v240_v38 = vadd.f32 %v239_v37, %v238_v35 }
 0x144   : > { %v241_v40 = vrot.slane %v240_v38, 1 }
 0x146   : > { %v242_v41 = vadd.f32 %v241_v40, %v240_v38 }
 0x148   : > { %432 = vpush %v242_v41 }
 0x149   : > { %434 = vpush %v305_v42 }
 0x179   : > { %s433_s9 = spop %432 }
 0x17a   : > { %v313_v47 = vstv %s433_s9  ;;  %s435_s22 = spop %434 }
 0x17b   : > { %v314_v49 = vstv %s435_s22 }
 0x17c   : > { %v319_v50 = vcombine.low %v313_v47, %v314_v49 }
 0x17e   : > { %v326_v51 = vrot.slane %v319_v50, %v325_v48 }
 0x180   : > { %v333_v53 = vrot.slane %v326_v51, %v325_v48 }
 0x182   : > { %v335_v54 = vadd.f32 %v333_v53, %v310_v52 }
 0x184   : > { %340 = vst.msk [vmem:[%s738_s21] sm:$0x3] %vm740_vm4, %v335_v54 }
 0x185 PF: > { %s14_s11 = sadd.s32 1, %s574_s11   ;;  %s776_s6 = smov %s558_s7 }
 0x186   : > { %p11_p8 = scmp.ge.s32.totalorder %s14_s11, 4   ;;  %s777_s7 = smov %s562_s8 }
 0x187   : > { %s778_s8 = smov %s641_s18  ;;  %s779_s9 = smov %s570_s10 }
 0x188   : > { %s780_s10 = smov %s782_s13  ;;  %13 = sbr.rel (!%p11_p8) target bundleno = 4 (0x4), region = 68 }
 0x18d   :  { %360 = vsyncpa [#allocation3], 1 }
 0x18e   :  { %362 = vsyncpa [#allocation3 + $0x1], 1 }

</bundles_post_ra>
